<compile_context>
chip_gen: v6e
topology: v6e:2x2x1
jax: 0.10.0
libtpu: 0.0.40
codegen_flags: <defaults>
</compile_context>

<pallas_src>
import math
from functools import partial

import jax
import jax.numpy as jnp
from jax import lax
from jax.experimental import pallas as pl
from jax.experimental.pallas import tpu as pltpu


def _round_up(x, m):
    return (x + m - 1) // m * m


def genresblock_kernel(x_ref, w1_ref, w2_ref,
                       s1_ref, t1_ref, s2_ref, t2_ref, b2_ref,
                       o_ref, pad1_ref, pad2_ref, acc1_ref, acc2_ref,
                       *, H, Nb, Hs):
    """Fused x + Conv2(ReLU(BN2(Conv1(ReLU(BN1(x)))))) for one image group.

    Layouts (per grid step; L = P*W*C is a multiple of 128):
      x_ref / o_ref : (Nb*H, L)        Nb row-groups stacked along sublanes,
                                       P images packed along lanes.
      pad{1,2}_ref  : (Nb*Hs + 2, L)   group i occupies rows i*Hs..i*Hs+H+1 =
                                       [top halo, H interior rows, bottom halo];
                                       trailing rows of each slot are don't-care.
      acc{1,2}_ref  : (Nb*Hs, L)       f32 accumulators; row i*Hs+h is the conv
                                       output of group i, image row h.
      w{1,2}_ref    : (3, K, N)        banded weights, one matmul per kernel row
                                       dy; horizontal SAME padding is folded
                                       into the band (no halo lanes in K).
    """
    KH = w1_ref.shape[0]              # 3 (kernel height)
    MM = Nb * Hs                      # rows produced by each conv matmul

    def zero_halo_rows(pad_ref):
        # Only 2*Nb full-width (lane-dense) row stores; there are no halo
        # columns to zero because horizontal padding lives in the band.
        z = jnp.zeros((1, pad_ref.shape[1]), pad_ref.dtype)
        for i in range(Nb):
            pad_ref[i * Hs:i * Hs + 1, :] = z                  # top halo
            pad_ref[i * Hs + H + 1:i * Hs + H + 2, :] = z      # bottom halo

    def conv(pad_ref, w_ref, acc_ref):
        # 3x3 SAME conv == KH banded bf16 matmuls over row-shifted slabs of the
        # padded buffer (rows beyond a group's halo only feed invalid acc rows).
        acc_ref[...] = jnp.dot(pad_ref[0:MM, :], w_ref[0],
                               preferred_element_type=jnp.float32)
        for dy in range(1, KH):
            acc_ref[...] += jnp.dot(pad_ref[dy:dy + MM, :], w_ref[dy],
                                    preferred_element_type=jnp.float32)

    # --- BN1 (eval-mode folded scale/shift) + ReLU -> padded buffer 1 --------
    x = x_ref[...].astype(jnp.float32)
    a1 = jnp.maximum(x * s1_ref[0] + t1_ref[0], 0.0).astype(pad1_ref.dtype)
    for i in range(Nb):                          # lane-dense, lane-0 aligned
        pad1_ref[i * Hs + 1:i * Hs + 1 + H, :] = a1[i * H:(i + 1) * H, :]
    zero_halo_rows(pad1_ref)

    # --- Conv1 (bias folded into the BN2 shift by the wrapper) ---------------
    conv(pad1_ref, w1_ref, acc1_ref)

    # --- BN2 + ReLU -> padded buffer 2 ---------------------------------------
    # One blanket lane-dense store: valid acc1 rows land on pad2 interiors, the
    # garbage seam rows land exactly on the halo rows, which are re-zeroed next.
    a2 = jnp.maximum(acc1_ref[...] * s2_ref[0] + t2_ref[0], 0.0
                     ).astype(pad2_ref.dtype)
    pad2_ref[1:1 + MM, :] = a2
    zero_halo_rows(pad2_ref)

    # --- Conv2 ----------------------------------------------------------------
    conv(pad2_ref, w2_ref, acc2_ref)

    # --- Residual add + conv2 bias (128-lane dense stores) --------------------
    for i in range(Nb):
        o_ref[i * H:(i + 1) * H, :] = (
            x_ref[i * H:(i + 1) * H, :].astype(jnp.float32)
            + acc2_ref[i * Hs:i * Hs + H, :]
            + b2_ref[0]).astype(o_ref.dtype)


def gen_res_block(x_nhwc, y, params):
    """Pallas forward.  `y` is ignored (num_classes == 0 branch)."""
    del y
    N, H, W, Cin = x_nhwc.shape
    P = params["P"]
    w1b = params["w1_band"]                      # (3, P*W*Cin, P*W*Ch)   bf16
    w2b = params["w2_band"]                      # (3, P*W*Ch,  P*W*Cout) bf16
    Ch = w1b.shape[2] // (P * W)
    Cout = w2b.shape[2] // (P * W)
    assert Cin == Cout, "residual add requires in_ch == out_ch"
    assert N % P == 0

    # Images per grid step: P packed in lanes, Nb stacked in sublanes so the
    # conv matmul M dimension approaches ~256 rows when N is large enough.
    Hs = _round_up(H + 2, 8)
    cap = max(1, 256 // Hs)
    Nb = 1
    for d in range(1, min(N // P, cap) + 1):
        if (N // P) % d == 0:
            Nb = d
    G = N // (P * Nb)

    Lx, Lh = P * W * Cin, P * W * Ch

    # (N,H,W,C) -> (G, Nb*H, P*W*C): Nb images stacked along rows, P along lanes.
    x2d = (x_nhwc.reshape(G, Nb, P, H, W * Cin)
                 .transpose(0, 1, 3, 2, 4)
                 .reshape(G, Nb * H, Lx))

    kern = partial(genresblock_kernel, H=H, Nb=Nb, Hs=Hs)

    out = pl.pallas_call(
        kern,
        out_shape=jax.ShapeDtypeStruct((G, Nb * H, Lx), x_nhwc.dtype),
        grid=(G,),
        in_specs=[
            pl.BlockSpec((None, Nb * H, Lx), lambda g: (g, 0, 0)),   # x
            pl.BlockSpec(w1b.shape, lambda g: (0, 0, 0)),            # conv1 band
            pl.BlockSpec(w2b.shape, lambda g: (0, 0, 0)),            # conv2 band
            pl.BlockSpec((1, Lx), lambda g: (0, 0)),                 # bn1 scale
            pl.BlockSpec((1, Lx), lambda g: (0, 0)),                 # bn1 shift
            pl.BlockSpec((1, Lh), lambda g: (0, 0)),                 # bn2 scale
            pl.BlockSpec((1, Lh), lambda g: (0, 0)),                 # bn2 shift+b1
            pl.BlockSpec((1, Lx), lambda g: (0, 0)),                 # conv2 bias
        ],
        out_specs=pl.BlockSpec((None, Nb * H, Lx), lambda g: (g, 0, 0)),
        scratch_shapes=[
            pltpu.VMEM((Nb * Hs + 2, Lx), jnp.bfloat16),   # padded act 1
            pltpu.VMEM((Nb * Hs + 2, Lh), jnp.bfloat16),   # padded act 2
            pltpu.VMEM((Nb * Hs, Lh), jnp.float32),        # conv1 accumulator
            pltpu.VMEM((Nb * Hs, Lx), jnp.float32),        # conv2 accumulator
        ],
        compiler_params=pltpu.CompilerParams(
            dimension_semantics=("parallel",),
            vmem_limit_bytes=32 * 1024 * 1024),
    )(x2d, w1b, w2b,
      params["s1_t"], params["t1_t"], params["s2_t"], params["t2_t"],
      params["b2_t"])

    return (out.reshape(G, Nb, H, P, W * Cout)
               .transpose(0, 1, 3, 2, 4)
               .reshape(N, H, W, Cout))


def init_params(key, in_ch, out_ch, h_ch, W, P, ksize=3, eps=1e-5):
    ks = jax.random.split(key, 12)
    fan1 = in_ch * ksize * ksize
    fan2 = h_ch * ksize * ksize
    # PyTorch conv layout (out, in, kh, kw)
    w1_oihw = jax.random.normal(ks[0], (h_ch, in_ch, ksize, ksize),
                                jnp.float32) / math.sqrt(fan1)
    w2_oihw = jax.random.normal(ks[1], (out_ch, h_ch, ksize, ksize),
                                jnp.float32) / math.sqrt(fan2)
    b1 = 0.1 * jax.random.normal(ks[2], (h_ch,), jnp.float32)
    b2 = 0.1 * jax.random.normal(ks[3], (out_ch,), jnp.float32)

    def bn(kg, kb, km, kv, c):
        gamma = 1.0 + 0.1 * jax.random.normal(kg, (c,), jnp.float32)
        beta = 0.1 * jax.random.normal(kb, (c,), jnp.float32)
        mean = 0.1 * jax.random.normal(km, (c,), jnp.float32)
        var = jax.random.uniform(kv, (c,), jnp.float32, 0.5, 1.5)
        scale = gamma / jnp.sqrt(var + eps)
        shift = beta - mean * scale
        return (gamma, beta, mean, var), scale, shift

    bn1_raw, s1, t1 = bn(ks[4], ks[5], ks[6], ks[7], in_ch)
    bn2_raw, s2, t2 = bn(ks[8], ks[9], ks[10], ks[11], h_ch)

    # (kh, kw, cin, cout)
    w1_hwio = jnp.transpose(w1_oihw, (2, 3, 1, 0))
    w2_hwio = jnp.transpose(w2_oihw, (2, 3, 1, 0))

    def banded(w_hwio):
        """band[dy][pin*Cin+ci, wout*Cout+co] = w[dy,dx,ci,co], pin = wout+dx-1.

        Horizontal SAME padding is folded into the band structure (taps that
        would read outside the row are simply absent), so K = W*Cin exactly.
        """
        kh, kw, cin, cout = w_hwio.shape
        bands = []
        for dy in range(kh):
            b = jnp.zeros((W * cin, W * cout), jnp.float32)
            for dx in range(kw):
                sel = (jnp.arange(W)[:, None]
                       == (jnp.arange(W)[None, :] + dx - 1)).astype(jnp.float32)
                b = b + jnp.kron(sel, w_hwio[dy, dx])
            bands.append(b)
        return jnp.stack(bands)                  # (kh, W*cin, W*cout) f32

    def lane_pack(band):
        """Block-diagonal expansion over the P lane-packed images."""
        if P == 1:
            return band.astype(jnp.bfloat16)
        kh, K, Nc = band.shape
        out = jnp.zeros((kh, P * K, P * Nc), jnp.float32)
        for p in range(P):
            out = out.at[:, p * K:(p + 1) * K, p * Nc:(p + 1) * Nc].set(band)
        return out.astype(jnp.bfloat16)

    # Fold conv1 bias into the BN2 shift:  bn2(c1 + b1) = s2*c1 + (s2*b1 + t2)
    t2_eff = s2 * b1 + t2

    params = dict(
        P=P,
        w1_band=lane_pack(banded(w1_hwio)),
        w2_band=lane_pack(banded(w2_hwio)),
        s1_t=jnp.tile(s1, W * P).reshape(1, P * W * in_ch),
        t1_t=jnp.tile(t1, W * P).reshape(1, P * W * in_ch),
        s2_t=jnp.tile(s2, W * P).reshape(1, P * W * h_ch),
        t2_t=jnp.tile(t2_eff, W * P).reshape(1, P * W * h_ch),
        b2_t=jnp.tile(b2, W * P).reshape(1, P * W * out_ch),
    )
    raw = dict(w1_oihw=w1_oihw, w2_oihw=w2_oihw, b1=b1, b2=b2,
               bn1=bn1_raw, bn2=bn2_raw, eps=eps)
    return params, raw


def reference_nhwc(x_nhwc, raw):
    """Pure-JAX f32 reference of the PyTorch module (eval-mode BN), NHWC."""
    eps = raw["eps"]

    def bn(x, p):
        gamma, beta, mean, var = p
        return (x - mean) / jnp.sqrt(var + eps) * gamma + beta

    def conv(x, w_oihw, b):
        w_hwio = jnp.transpose(w_oihw, (2, 3, 1, 0))
        y = lax.conv_general_dilated(
            x, w_hwio, (1, 1), "SAME",
            dimension_numbers=("NHWC", "HWIO", "NHWC"))
        return y + b

    h = jax.nn.relu(bn(x_nhwc, raw["bn1"]))
    h = conv(h, raw["w1_oihw"], raw["b1"])
    h = jax.nn.relu(bn(h, raw["bn2"]))
    h = conv(h, raw["w2_oihw"], raw["b2"])
    return x_nhwc + h


if __name__ == "__main__":
    key = jax.random.PRNGKey(0)
    N, C, H, W = 2, 4, 16, 16          # residual requires in_ch == out_ch
    in_ch = out_ch = h_ch = C

    kx, kp = jax.random.split(key)
    x_nchw = jax.random.normal(kx, (N, C, H, W), jnp.float32)  # PyTorch layout
    y = jnp.zeros((N,), jnp.int32)                             # unused (num_classes == 0)

    # Lane-packing factor: pack P images along lanes so the last dim of every
    # activation block is a multiple of 128 (W*C = 64 -> P = 2).
    lane0 = W * in_ch
    P = 1 if (lane0 >= 128 or 128 % lane0 != 0) else 128 // lane0
    if N % P != 0:
        P = 1

    params, raw = init_params(kp, in_ch, out_ch, h_ch, W, P)

    x_nhwc = jnp.transpose(x_nchw, (0, 2, 3, 1))
    out_nhwc = gen_res_block(x_nhwc, y, params)
    out_nhwc = jax.block_until_ready(out_nhwc)

    ref_nhwc = reference_nhwc(x_nhwc, raw)
    err = float(jnp.max(jnp.abs(out_nhwc - ref_nhwc)))
    assert out_nhwc.shape == (N, H, W, out_ch)
    # Kernel uses bf16 MXU inputs with f32 accumulation -> expect ~1e-3..1e-2
    # deviation from the pure-f32 reference.
    assert jnp.allclose(out_nhwc, ref_nhwc, atol=5e-2, rtol=5e-2), err

    print("KERNEL_OK")
</pallas_src>

<mosaic_0001>
module attributes {stable_mosaic.version = 11 : i64} {
  func.func @genresblock_kernel(%arg0: i32, %arg1: memref<1x16x128xf32, #tpu.memory_space<vmem>>, %arg2: memref<3x128x128xbf16, #tpu.memory_space<vmem>>, %arg3: memref<3x128x128xbf16, #tpu.memory_space<vmem>>, %arg4: memref<1x128xf32, #tpu.memory_space<vmem>>, %arg5: memref<1x128xf32, #tpu.memory_space<vmem>>, %arg6: memref<1x128xf32, #tpu.memory_space<vmem>>, %arg7: memref<1x128xf32, #tpu.memory_space<vmem>>, %arg8: memref<1x128xf32, #tpu.memory_space<vmem>>, %arg9: memref<1x16x128xf32, #tpu.memory_space<vmem>>, %arg10: memref<26x128xbf16, #tpu.memory_space<vmem>>, %arg11: memref<26x128xbf16, #tpu.memory_space<vmem>>, %arg12: memref<24x128xf32, #tpu.memory_space<vmem>>, %arg13: memref<24x128xf32, #tpu.memory_space<vmem>>) attributes {dimension_semantics = [#tpu.dimension_semantics<parallel>], iteration_bounds = array<i64: 1>, scalar_prefetch = 0 : i64, scratch_operands = 4 : i64, tpu.core_type = #tpu.core_type<tc>, window_params = [{transform_indices = @transform_0, window_bounds = array<i64: 1, 16, 128>}, {pipeline_mode = #tpu.pipeline_mode<synchronous>, transform_indices = @transform_1, window_bounds = array<i64: 3, 128, 128>}, {pipeline_mode = #tpu.pipeline_mode<synchronous>, transform_indices = @transform_2, window_bounds = array<i64: 3, 128, 128>}, {pipeline_mode = #tpu.pipeline_mode<synchronous>, transform_indices = @transform_3, window_bounds = array<i64: 1, 128>}, {pipeline_mode = #tpu.pipeline_mode<synchronous>, transform_indices = @transform_4, window_bounds = array<i64: 1, 128>}, {pipeline_mode = #tpu.pipeline_mode<synchronous>, transform_indices = @transform_5, window_bounds = array<i64: 1, 128>}, {pipeline_mode = #tpu.pipeline_mode<synchronous>, transform_indices = @transform_6, window_bounds = array<i64: 1, 128>}, {pipeline_mode = #tpu.pipeline_mode<synchronous>, transform_indices = @transform_7, window_bounds = array<i64: 1, 128>}, {transform_indices = @transform_8, window_bounds = array<i64: 1, 16, 128>}]} {
    %c0 = arith.constant 0 : index
    %c0_0 = arith.constant 0 : index
    %c0_1 = arith.constant 0 : index
    %0 = vector.load %arg1[%c0, %c0_0, %c0_1] : memref<1x16x128xf32, #tpu.memory_space<vmem>>, vector<1x16x128xf32>
    %1 = vector.shape_cast %0 : vector<1x16x128xf32> to vector<16x128xf32>
    %c0_2 = arith.constant 0 : index
    %c0_3 = arith.constant 0 : index
    %2 = vector.load %arg4[%c0_2, %c0_3] : memref<1x128xf32, #tpu.memory_space<vmem>>, vector<1x128xf32>
    %3 = vector.shape_cast %2 : vector<1x128xf32> to vector<128xf32>
    %4 = vector.shape_cast %3 : vector<128xf32> to vector<1x128xf32>
    %5 = vector.broadcast %4 : vector<1x128xf32> to vector<16x128xf32>
    %6 = arith.mulf %1, %5 : vector<16x128xf32>
    %c0_4 = arith.constant 0 : index
    %c0_5 = arith.constant 0 : index
    %7 = vector.load %arg5[%c0_4, %c0_5] : memref<1x128xf32, #tpu.memory_space<vmem>>, vector<1x128xf32>
    %8 = vector.shape_cast %7 : vector<1x128xf32> to vector<128xf32>
    %9 = vector.shape_cast %8 : vector<128xf32> to vector<1x128xf32>
    %10 = vector.broadcast %9 : vector<1x128xf32> to vector<16x128xf32>
    %11 = arith.addf %6, %10 : vector<16x128xf32>
    %cst = arith.constant 0.000000e+00 : f32
    %12 = vector.broadcast %cst : f32 to vector<16x128xf32>
    %13 = arith.maximumf %11, %12 : vector<16x128xf32>
    %14 = arith.truncf %13 : vector<16x128xf32> to vector<16x128xbf16>
    %c1 = arith.constant 1 : index
    %c0_6 = arith.constant 0 : index
    %15 = vector.load %arg10[%c1, %c0_6] : memref<26x128xbf16, #tpu.memory_space<vmem>>, vector<16x128xbf16>
    tpu.vector_store %arg10[%c1, %c0_6], %14 {strides = array<i32>} : memref<26x128xbf16, #tpu.memory_space<vmem>>, vector<16x128xbf16>,
    %cst_7 = arith.constant 0.000000e+00 : bf16
    %16 = vector.broadcast %cst_7 : bf16 to vector<1x128xbf16>
    %c0_8 = arith.constant 0 : index
    %c0_9 = arith.constant 0 : index
    %17 = vector.load %arg10[%c0_8, %c0_9] : memref<26x128xbf16, #tpu.memory_space<vmem>>, vector<1x128xbf16>
    tpu.vector_store %arg10[%c0_8, %c0_9], %16 {strides = array<i32>} : memref<26x128xbf16, #tpu.memory_space<vmem>>, vector<1x128xbf16>,
    %c17 = arith.constant 17 : index
    %c0_10 = arith.constant 0 : index
    %18 = vector.load %arg10[%c17, %c0_10] : memref<26x128xbf16, #tpu.memory_space<vmem>>, vector<1x128xbf16>
    tpu.vector_store %arg10[%c17, %c0_10], %16 {strides = array<i32>} : memref<26x128xbf16, #tpu.memory_space<vmem>>, vector<1x128xbf16>,
    %c0_11 = arith.constant 0 : index
    %c0_12 = arith.constant 0 : index
    %19 = vector.load %arg10[%c0_11, %c0_12] : memref<26x128xbf16, #tpu.memory_space<vmem>>, vector<24x128xbf16>
    %c0_13 = arith.constant 0 : index
    %c0_14 = arith.constant 0 : index
    %c0_15 = arith.constant 0 : index
    %20 = vector.load %arg2[%c0_13, %c0_14, %c0_15] : memref<3x128x128xbf16, #tpu.memory_space<vmem>>, vector<1x128x128xbf16>
    %21 = vector.shape_cast %20 : vector<1x128x128xbf16> to vector<128x128xbf16>
    %cst_16 = arith.constant dense<0.000000e+00> : vector<24x128xf32>
    %22 = tpu.matmul %19, %21, %cst_16 {dimension_numbers = #tpu.dot_dimension_numbers<[1], [0], [0], [1], [0, 0, 1, 1], [], []>} : vector<24x128xbf16>, vector<128x128xbf16>, vector<24x128xf32> -> vector<24x128xf32>
    %c0_17 = arith.constant 0 : index
    %c0_18 = arith.constant 0 : index
    %23 = vector.load %arg12[%c0_17, %c0_18] : memref<24x128xf32, #tpu.memory_space<vmem>>, vector<24x128xf32>
    tpu.vector_store %arg12[%c0_17, %c0_18], %22 {strides = array<i32>} : memref<24x128xf32, #tpu.memory_space<vmem>>, vector<24x128xf32>,
    %c0_19 = arith.constant 0 : index
    %c0_20 = arith.constant 0 : index
    %24 = vector.load %arg12[%c0_19, %c0_20] : memref<24x128xf32, #tpu.memory_space<vmem>>, vector<24x128xf32>
    %c1_21 = arith.constant 1 : index
    %c0_22 = arith.constant 0 : index
    %25 = vector.load %arg10[%c1_21, %c0_22] : memref<26x128xbf16, #tpu.memory_space<vmem>>, vector<24x128xbf16>
    %c1_23 = arith.constant 1 : index
    %c0_24 = arith.constant 0 : index
    %c0_25 = arith.constant 0 : index
    %26 = vector.load %arg2[%c1_23, %c0_24, %c0_25] : memref<3x128x128xbf16, #tpu.memory_space<vmem>>, vector<1x128x128xbf16>
    %27 = vector.shape_cast %26 : vector<1x128x128xbf16> to vector<128x128xbf16>
    %cst_26 = arith.constant dense<0.000000e+00> : vector<24x128xf32>
    %28 = tpu.matmul %25, %27, %cst_26 {dimension_numbers = #tpu.dot_dimension_numbers<[1], [0], [0], [1], [0, 0, 1, 1], [], []>} : vector<24x128xbf16>, vector<128x128xbf16>, vector<24x128xf32> -> vector<24x128xf32>
    %29 = arith.addf %24, %28 : vector<24x128xf32>
    %c0_27 = arith.constant 0 : index
    %c0_28 = arith.constant 0 : index
    %30 = vector.load %arg12[%c0_27, %c0_28] : memref<24x128xf32, #tpu.memory_space<vmem>>, vector<24x128xf32>
    tpu.vector_store %arg12[%c0_27, %c0_28], %29 {strides = array<i32>} : memref<24x128xf32, #tpu.memory_space<vmem>>, vector<24x128xf32>,
    %c0_29 = arith.constant 0 : index
    %c0_30 = arith.constant 0 : index
    %31 = vector.load %arg12[%c0_29, %c0_30] : memref<24x128xf32, #tpu.memory_space<vmem>>, vector<24x128xf32>
    %c2 = arith.constant 2 : index
    %c0_31 = arith.constant 0 : index
    %32 = vector.load %arg10[%c2, %c0_31] : memref<26x128xbf16, #tpu.memory_space<vmem>>, vector<24x128xbf16>
    %c2_32 = arith.constant 2 : index
    %c0_33 = arith.constant 0 : index
    %c0_34 = arith.constant 0 : index
    %33 = vector.load %arg2[%c2_32, %c0_33, %c0_34] : memref<3x128x128xbf16, #tpu.memory_space<vmem>>, vector<1x128x128xbf16>
    %34 = vector.shape_cast %33 : vector<1x128x128xbf16> to vector<128x128xbf16>
    %cst_35 = arith.constant dense<0.000000e+00> : vector<24x128xf32>
    %35 = tpu.matmul %32, %34, %cst_35 {dimension_numbers = #tpu.dot_dimension_numbers<[1], [0], [0], [1], [0, 0, 1, 1], [], []>} : vector<24x128xbf16>, vector<128x128xbf16>, vector<24x128xf32> -> vector<24x128xf32>
    %36 = arith.addf %31, %35 : vector<24x128xf32>
    %c0_36 = arith.constant 0 : index
    %c0_37 = arith.constant 0 : index
    %37 = vector.load %arg12[%c0_36, %c0_37] : memref<24x128xf32, #tpu.memory_space<vmem>>, vector<24x128xf32>
    tpu.vector_store %arg12[%c0_36, %c0_37], %36 {strides = array<i32>} : memref<24x128xf32, #tpu.memory_space<vmem>>, vector<24x128xf32>,
    %c0_38 = arith.constant 0 : index
    %c0_39 = arith.constant 0 : index
    %38 = vector.load %arg12[%c0_38, %c0_39] : memref<24x128xf32, #tpu.memory_space<vmem>>, vector<24x128xf32>
    %c0_40 = arith.constant 0 : index
    %c0_41 = arith.constant 0 : index
    %39 = vector.load %arg6[%c0_40, %c0_41] : memref<1x128xf32, #tpu.memory_space<vmem>>, vector<1x128xf32>
    %40 = vector.shape_cast %39 : vector<1x128xf32> to vector<128xf32>
    %41 = vector.shape_cast %40 : vector<128xf32> to vector<1x128xf32>
    %42 = vector.broadcast %41 : vector<1x128xf32> to vector<24x128xf32>
    %43 = arith.mulf %38, %42 : vector<24x128xf32>
    %c0_42 = arith.constant 0 : index
    %c0_43 = arith.constant 0 : index
    %44 = vector.load %arg7[%c0_42, %c0_43] : memref<1x128xf32, #tpu.memory_space<vmem>>, vector<1x128xf32>
    %45 = vector.shape_cast %44 : vector<1x128xf32> to vector<128xf32>
    %46 = vector.shape_cast %45 : vector<128xf32> to vector<1x128xf32>
    %47 = vector.broadcast %46 : vector<1x128xf32> to vector<24x128xf32>
    %48 = arith.addf %43, %47 : vector<24x128xf32>
    %cst_44 = arith.constant 0.000000e+00 : f32
    %49 = vector.broadcast %cst_44 : f32 to vector<24x128xf32>
    %50 = arith.maximumf %48, %49 : vector<24x128xf32>
    %51 = arith.truncf %50 : vector<24x128xf32> to vector<24x128xbf16>
    %c1_45 = arith.constant 1 : index
    %c0_46 = arith.constant 0 : index
    %52 = vector.load %arg11[%c1_45, %c0_46] : memref<26x128xbf16, #tpu.memory_space<vmem>>, vector<24x128xbf16>
    tpu.vector_store %arg11[%c1_45, %c0_46], %51 {strides = array<i32>} : memref<26x128xbf16, #tpu.memory_space<vmem>>, vector<24x128xbf16>,
    %cst_47 = arith.constant 0.000000e+00 : bf16
    %53 = vector.broadcast %cst_47 : bf16 to vector<1x128xbf16>
    %c0_48 = arith.constant 0 : index
    %c0_49 = arith.constant 0 : index
    %54 = vector.load %arg11[%c0_48, %c0_49] : memref<26x128xbf16, #tpu.memory_space<vmem>>, vector<1x128xbf16>
    tpu.vector_store %arg11[%c0_48, %c0_49], %53 {strides = array<i32>} : memref<26x128xbf16, #tpu.memory_space<vmem>>, vector<1x128xbf16>,
    %c17_50 = arith.constant 17 : index
    %c0_51 = arith.constant 0 : index
    %55 = vector.load %arg11[%c17_50, %c0_51] : memref<26x128xbf16, #tpu.memory_space<vmem>>, vector<1x128xbf16>
    tpu.vector_store %arg11[%c17_50, %c0_51], %53 {strides = array<i32>} : memref<26x128xbf16, #tpu.memory_space<vmem>>, vector<1x128xbf16>,
    %c0_52 = arith.constant 0 : index
    %c0_53 = arith.constant 0 : index
    %56 = vector.load %arg11[%c0_52, %c0_53] : memref<26x128xbf16, #tpu.memory_space<vmem>>, vector<24x128xbf16>
    %c0_54 = arith.constant 0 : index
    %c0_55 = arith.constant 0 : index
    %c0_56 = arith.constant 0 : index
    %57 = vector.load %arg3[%c0_54, %c0_55, %c0_56] : memref<3x128x128xbf16, #tpu.memory_space<vmem>>, vector<1x128x128xbf16>
    %58 = vector.shape_cast %57 : vector<1x128x128xbf16> to vector<128x128xbf16>
    %cst_57 = arith.constant dense<0.000000e+00> : vector<24x128xf32>
    %59 = tpu.matmul %56, %58, %cst_57 {dimension_numbers = #tpu.dot_dimension_numbers<[1], [0], [0], [1], [0, 0, 1, 1], [], []>} : vector<24x128xbf16>, vector<128x128xbf16>, vector<24x128xf32> -> vector<24x128xf32>
    %c0_58 = arith.constant 0 : index
    %c0_59 = arith.constant 0 : index
    %60 = vector.load %arg13[%c0_58, %c0_59] : memref<24x128xf32, #tpu.memory_space<vmem>>, vector<24x128xf32>
    tpu.vector_store %arg13[%c0_58, %c0_59], %59 {strides = array<i32>} : memref<24x128xf32, #tpu.memory_space<vmem>>, vector<24x128xf32>,
    %c0_60 = arith.constant 0 : index
    %c0_61 = arith.constant 0 : index
    %61 = vector.load %arg13[%c0_60, %c0_61] : memref<24x128xf32, #tpu.memory_space<vmem>>, vector<24x128xf32>
    %c1_62 = arith.constant 1 : index
    %c0_63 = arith.constant 0 : index
    %62 = vector.load %arg11[%c1_62, %c0_63] : memref<26x128xbf16, #tpu.memory_space<vmem>>, vector<24x128xbf16>
    %c1_64 = arith.constant 1 : index
    %c0_65 = arith.constant 0 : index
    %c0_66 = arith.constant 0 : index
    %63 = vector.load %arg3[%c1_64, %c0_65, %c0_66] : memref<3x128x128xbf16, #tpu.memory_space<vmem>>, vector<1x128x128xbf16>
    %64 = vector.shape_cast %63 : vector<1x128x128xbf16> to vector<128x128xbf16>
    %cst_67 = arith.constant dense<0.000000e+00> : vector<24x128xf32>
    %65 = tpu.matmul %62, %64, %cst_67 {dimension_numbers = #tpu.dot_dimension_numbers<[1], [0], [0], [1], [0, 0, 1, 1], [], []>} : vector<24x128xbf16>, vector<128x128xbf16>, vector<24x128xf32> -> vector<24x128xf32>
    %66 = arith.addf %61, %65 : vector<24x128xf32>
    %c0_68 = arith.constant 0 : index
    %c0_69 = arith.constant 0 : index
    %67 = vector.load %arg13[%c0_68, %c0_69] : memref<24x128xf32, #tpu.memory_space<vmem>>, vector<24x128xf32>
    tpu.vector_store %arg13[%c0_68, %c0_69], %66 {strides = array<i32>} : memref<24x128xf32, #tpu.memory_space<vmem>>, vector<24x128xf32>,
    %c0_70 = arith.constant 0 : index
    %c0_71 = arith.constant 0 : index
    %68 = vector.load %arg13[%c0_70, %c0_71] : memref<24x128xf32, #tpu.memory_space<vmem>>, vector<24x128xf32>
    %c2_72 = arith.constant 2 : index
    %c0_73 = arith.constant 0 : index
    %69 = vector.load %arg11[%c2_72, %c0_73] : memref<26x128xbf16, #tpu.memory_space<vmem>>, vector<24x128xbf16>
    %c2_74 = arith.constant 2 : index
    %c0_75 = arith.constant 0 : index
    %c0_76 = arith.constant 0 : index
    %70 = vector.load %arg3[%c2_74, %c0_75, %c0_76] : memref<3x128x128xbf16, #tpu.memory_space<vmem>>, vector<1x128x128xbf16>
    %71 = vector.shape_cast %70 : vector<1x128x128xbf16> to vector<128x128xbf16>
    %cst_77 = arith.constant dense<0.000000e+00> : vector<24x128xf32>
    %72 = tpu.matmul %69, %71, %cst_77 {dimension_numbers = #tpu.dot_dimension_numbers<[1], [0], [0], [1], [0, 0, 1, 1], [], []>} : vector<24x128xbf16>, vector<128x128xbf16>, vector<24x128xf32> -> vector<24x128xf32>
    %73 = arith.addf %68, %72 : vector<24x128xf32>
    %c0_78 = arith.constant 0 : index
    %c0_79 = arith.constant 0 : index
    %74 = vector.load %arg13[%c0_78, %c0_79] : memref<24x128xf32, #tpu.memory_space<vmem>>, vector<24x128xf32>
    tpu.vector_store %arg13[%c0_78, %c0_79], %73 {strides = array<i32>} : memref<24x128xf32, #tpu.memory_space<vmem>>, vector<24x128xf32>,
    %c0_80 = arith.constant 0 : index
    %c0_81 = arith.constant 0 : index
    %c0_82 = arith.constant 0 : index
    %75 = vector.load %arg1[%c0_80, %c0_81, %c0_82] : memref<1x16x128xf32, #tpu.memory_space<vmem>>, vector<1x16x128xf32>
    %76 = vector.shape_cast %75 : vector<1x16x128xf32> to vector<16x128xf32>
    %c0_83 = arith.constant 0 : index
    %c0_84 = arith.constant 0 : index
    %77 = vector.load %arg13[%c0_83, %c0_84] : memref<24x128xf32, #tpu.memory_space<vmem>>, vector<16x128xf32>
    %78 = arith.addf %76, %77 : vector<16x128xf32>
    %c0_85 = arith.constant 0 : index
    %c0_86 = arith.constant 0 : index
    %79 = vector.load %arg8[%c0_85, %c0_86] : memref<1x128xf32, #tpu.memory_space<vmem>>, vector<1x128xf32>
    %80 = vector.shape_cast %79 : vector<1x128xf32> to vector<128xf32>
    %81 = vector.shape_cast %80 : vector<128xf32> to vector<1x128xf32>
    %82 = vector.broadcast %81 : vector<1x128xf32> to vector<16x128xf32>
    %83 = arith.addf %78, %82 : vector<16x128xf32>
    %c0_87 = arith.constant 0 : index
    %c0_88 = arith.constant 0 : index
    %c0_89 = arith.constant 0 : index
    %84 = vector.load %arg9[%c0_87, %c0_88, %c0_89] : memref<1x16x128xf32, #tpu.memory_space<vmem>>, vector<1x16x128xf32>
    %85 = vector.shape_cast %84 : vector<1x16x128xf32> to vector<16x128xf32>
    %86 = vector.shape_cast %83 : vector<16x128xf32> to vector<1x16x128xf32>
    tpu.vector_store %arg9[%c0_87, %c0_88, %c0_89], %86 {strides = array<i32>} : memref<1x16x128xf32, #tpu.memory_space<vmem>>, vector<1x16x128xf32>,
    return
  }
  func.func @transform_0(%arg0: i32) -> (i32, i32, i32) {
    %c0_i32 = arith.constant 0 : i32
    %c0_i32_0 = arith.constant 0 : i32
    %c0_i32_1 = arith.constant 0 : i32
    return %arg0, %c0_i32, %c0_i32_0 : i32, i32, i32
  }
  func.func @transform_1(%arg0: i32) -> (i32, i32, i32) {
    %c0_i32 = arith.constant 0 : i32
    %c0_i32_0 = arith.constant 0 : i32
    %c0_i32_1 = arith.constant 0 : i32
    %c0_i32_2 = arith.constant 0 : i32
    return %c0_i32, %c0_i32_0, %c0_i32_1 : i32, i32, i32
  }
  func.func @transform_2(%arg0: i32) -> (i32, i32, i32) {
    %c0_i32 = arith.constant 0 : i32
    %c0_i32_0 = arith.constant 0 : i32
    %c0_i32_1 = arith.constant 0 : i32
    %c0_i32_2 = arith.constant 0 : i32
    return %c0_i32, %c0_i32_0, %c0_i32_1 : i32, i32, i32
  }
  func.func @transform_3(%arg0: i32) -> (i32, i32) {
    %c0_i32 = arith.constant 0 : i32
    %c0_i32_0 = arith.constant 0 : i32
    %c0_i32_1 = arith.constant 0 : i32
    return %c0_i32, %c0_i32_0 : i32, i32
  }
  func.func @transform_4(%arg0: i32) -> (i32, i32) {
    %c0_i32 = arith.constant 0 : i32
    %c0_i32_0 = arith.constant 0 : i32
    %c0_i32_1 = arith.constant 0 : i32
    return %c0_i32, %c0_i32_0 : i32, i32
  }
  func.func @transform_5(%arg0: i32) -> (i32, i32) {
    %c0_i32 = arith.constant 0 : i32
    %c0_i32_0 = arith.constant 0 : i32
    %c0_i32_1 = arith.constant 0 : i32
    return %c0_i32, %c0_i32_0 : i32, i32
  }
  func.func @transform_6(%arg0: i32) -> (i32, i32) {
    %c0_i32 = arith.constant 0 : i32
    %c0_i32_0 = arith.constant 0 : i32
    %c0_i32_1 = arith.constant 0 : i32
    return %c0_i32, %c0_i32_0 : i32, i32
  }
  func.func @transform_7(%arg0: i32) -> (i32, i32) {
    %c0_i32 = arith.constant 0 : i32
    %c0_i32_0 = arith.constant 0 : i32
    %c0_i32_1 = arith.constant 0 : i32
    return %c0_i32, %c0_i32_0 : i32, i32
  }
  func.func @transform_8(%arg0: i32) -> (i32, i32, i32) {
    %c0_i32 = arith.constant 0 : i32
    %c0_i32_0 = arith.constant 0 : i32
    %c0_i32_1 = arith.constant 0 : i32
    return %arg0, %c0_i32, %c0_i32_0 : i32, i32, i32
  }
}

</mosaic_0001>

<bundles_post_ra>
// kernel: tpu_custom_call.1
= control target key start
LH: loop header
LB: loop body
LE: loop exit
PB: predicated region body
PF: predicated region fallthrough
CT: control target
= control target key end

     0   :  { %13 = vsyncpa [#allocation7], 0  ;;  %s1659_s0 = inlined_call_operand.hbm [shape: f32[1,16,128], index: 0, kind: input, shape index: {}]   ;;  %s1660_s1 = inlined_call_operand.hbm [shape: bf16[3,128,128], index: 1, kind: input, shape index: {}]   ;;  %s1661_s2 = inlined_call_operand.hbm [shape: bf16[3,128,128], index: 2, kind: input, shape index: {}]   ;;  %s1662_s3 = inlined_call_operand.vmem [shape: f32[1,128], index: 3, kind: input, shape index: {}]   ;;  %s1663_s4 = inlined_call_operand.vmem [shape: f32[1,128], index: 4, kind: input, shape index: {}]   ;;  %s1664_s5 = inlined_call_operand.vmem [shape: f32[1,128], index: 5, kind: input, shape index: {}]   ;;  %s1665_s6 = inlined_call_operand.vmem [shape: f32[1,128], index: 6, kind: input, shape index: {}]   ;;  %s1666_s7 = inlined_call_operand.vmem [shape: f32[1,128], index: 7, kind: input, shape index: {}]   ;;  %s1667_s8 = inlined_call_operand.hbm [shape: f32[1,16,128], index: 8, kind: output, shape index: {}]  }
   0x1   :  { %14 = vsyncpa [#allocation10], 0 }
   0x2   :  { %15 = vsyncpa [#allocation8], 0  ;;  %s1512_s27 = smov [#allocation9]  }
   0x3   :  { %s33_s28 = sshll.u32 %s1512_s27, 4  ;;  %s34_s28 = int_to_ptr.vmem [resolvable:$true] %s33_s28 }
   0x4   :  { %s1434_s29 = scalar_lea.vmem %s34_s28, 3072  ;;  %p1439_p1 = scmp.lt.s32.totalorder %s34_s28, %s34_s28 }
   0x5   :  { %p1435_p0 = scmp.ne.s32.totalorder %s34_s28, %s1434_s29  ;;  %p1440_p2 = scmp.lt.s32.totalorder %s1434_s29, %s1434_s29 }
   0x7   :  { %p1441_p3 = por %p1440_p2, %p1439_p1 }
   0x9   :  { %p1442_p4 = pnand %p1441_p3, %p1435_p0 }
   0xb   :  { %1445 = shalt.err (!%p1442_p4)
}
   0xc   :  { %s1513_s30 = smov 64   ;;  %s1514_s9 = smov 4  }
   0xd   :  { %39 = dma.hbm_to_vmem [thread:$0]  %s1660_s1, 3072, %s34_s28, [#allocation10], %s1513_s30, %s1513_s30, %s1514_s9  }
   0xe   :  { %s1515_s12 = smov [#allocation6]  }
   0xf   :  { %s21_s13 = sshll.u32 %s1515_s12, 4  ;;  %s22_s13 = int_to_ptr.vmem [resolvable:$true] %s21_s13 }
  0x10   :  { %s1454_s14 = scalar_lea.vmem %s22_s13, 256  ;;  %p1459_p6 = scmp.lt.s32.totalorder %s22_s13, %s22_s13 }
  0x11   :  { %p1455_p5 = scmp.ne.s32.totalorder %s22_s13, %s1454_s14  ;;  %p1460_p7 = scmp.lt.s32.totalorder %s1454_s14, %s1454_s14 }
  0x13   :  { %p1461_p8 = por %p1460_p7, %p1459_p6 }
  0x15   :  { %p1462_p9 = pnand %p1461_p8, %p1455_p5 }
  0x17   :  { %1465 = shalt.err (!%p1462_p9)
}
  0x18   :  { %s1516_s15 = smov 128   ;;  %s1517_s16 = smov 8  }
  0x19   :  { %27 = dma.hbm_to_vmem [thread:$0]  %s1659_s0, 256, %s22_s13, [#allocation7], %s1516_s15, %s1516_s15, %s1517_s16  }
  0x1a   :  { %s1518_s1 = smov [#allocation11]  }
  0x1b   :  { %s45_s19 = sshll.u32 %s1518_s1, 4  ;;  %s46_s19 = int_to_ptr.vmem [resolvable:$true] %s45_s19 }
  0x1c   :  { %s1474_s20 = scalar_lea.vmem %s46_s19, 3072  ;;  %p1479_p11 = scmp.lt.s32.totalorder %s46_s19, %s46_s19 }
  0x1d   :  { %p1475_p10 = scmp.ne.s32.totalorder %s46_s19, %s1474_s20  ;;  %p1480_p12 = scmp.lt.s32.totalorder %s1474_s20, %s1474_s20 }
  0x1f   :  { %p1481_p13 = por %p1480_p12, %p1479_p11 }
  0x21   :  { %p1482_p0 = pnand %p1481_p13, %p1475_p10 }
  0x23   :  { %1485 = shalt.err (!%p1482_p0)
}
  0x24   :  { %51 = dma.hbm_to_vmem [thread:$0]  %s1661_s2, 3072, %s46_s19, [#allocation10], %s1513_s30, %s1513_s30, %s1514_s9  }
  0x25   :  { %1506 = dma.done.wait [#allocation7], 256  }
  0x26   :  { %1507 = vsyncadd [#allocation7], 4294967040 }
  0x27   :  { %1508 = dma.done.wait [#allocation10], 6144  }
  0x28   :  { %1509 = vsyncadd [#allocation10], 4294961152  ;;  %v1366_v0 = vld [vmem:[#allocation9 + $0x38] sm:$0xff]   ;;  %v1367_v1 = vld [vmem:[#allocation9 + $0x30] sm:$0xff]   ;;  %vm100_vm0 = vsmask.f32 256 }
  0x29   :  { %1238 = vmatprep.subr.bf16.mxu0 %v1366_v0  ;;  %v1369_v2 = vld [vmem:[#allocation9 + $0x78] sm:$0xff]   ;;  %v1368_v3 = vld [vmem:[#allocation9 + $0x28] sm:$0xff]   ;;  %v1371_v4 = vld [vmem:[#allocation9 + $0x70] sm:$0xff]   ;;  %vm101_vm1 = vsmask.f32 4368  ;;  %vm123_vm3 = vcmask 1043456  }
  0x2a   :  { %1239 = vmatpush3.bf16.msra.mxu0 %v1366_v0  ;;  %1258 = vmatprep.subr.bf16.mxu1 %v1369_v2  ;;  %v1373_v5 = vld [vmem:[#allocation9 + $0x68] sm:$0xff]   ;;  %v1370_v6 = vld [vmem:[#allocation9 + $0x20] sm:$0xff]   ;;  %v1372_v8 = vld [vmem:[#allocation9 + $0x18] sm:$0xff]   ;;  %vm124_vm2 = vsmask.f32 7938  ;;  %vm130_vm5 = vcmask 1040384  }
  0x2b   :  { %1240 = vmatprep.subr.bf16.mxu0 %v1367_v1  ;;  %1259 = vmatpush3.bf16.msra.mxu1 %v1369_v2  ;;  %v1375_v7 = vld [vmem:[#allocation9 + $0x60] sm:$0xff]   ;;  %v1577_v9 = vld [vmem:[#allocation6] sm:$0xff]  ;;  %v1579_v10 = vld [vmem:[#allocation6 + $0x8] sm:$0xff]  ;;  %vm458_vm9 = vcmask 1046528   ;;  %vm304_vm10 = vsmask.f32 7424 }
  0x2c   :  { %1260 = vmatprep.subr.bf16.mxu1 %v1371_v4  ;;  %v1103_v11 = vld [vmem:[%s1662_s3] ss:$0 sm:$0xff]  ;;  %v1377_v12 = vld [vmem:[#allocation9 + $0x58] sm:$0xff]   ;;  %v1376_v22 = vld [vmem:[#allocation9 + $0x8] sm:$0xff]   ;;  %s1519_s27 = smov [#allocation12]  }
  0x2d   :  { %v81_v13 = vmul.f32 %v1103_v11, %v1577_v9  ;;  %v82_v14 = vmul.f32 %v1103_v11, %v1579_v10  ;;  %v1104_v15 = vld [vmem:[%s1663_s4] ss:$0 sm:$0xff]  ;;  %vm1591_vm4 = vmor %vm100_vm0, %vm101_vm1  ;;  %v1378_v26 = vld [vmem:[#allocation9] sm:$0xff]   ;;  %s1090_s28 = sshll.u32 %s1519_s27, 4  ;;  %s1091_s28 = int_to_ptr.vmem [resolvable:$true] %s1090_s28 }
  0x2e   :  { %1241 = vmatpush3.bf16.msra.mxu0 %v1367_v1  ;;  %v1374_v16 = vld [vmem:[#allocation9 + $0x10] sm:$0xff]   ;;  %v1381_v27 = vld [vmem:[#allocation9 + $0x48] sm:$0xff]   ;;  %vm1596_vm6 = vmand %vm123_vm3, %vm124_vm2  ;;  %s1486_s29 = scalar_lea.vmem %s1091_s28, 256  ;;  %p1491_p2 = scmp.lt.s32.totalorder %s1091_s28, %s1091_s28 }
  0x2f   :  { %1242 = vmatprep.subr.bf16.mxu0 %v1368_v3  ;;  %1261 = vmatpush3.bf16.msra.mxu1 %v1371_v4  ;;  %v90_v17 = vadd.f32 %v1104_v15, %v81_v13  ;;  %v91_v18 = vadd.f32 %v1104_v15, %v82_v14  ;;  %v1379_v19 = vld [vmem:[#allocation9 + $0x50] sm:$0xff]   ;;  %vm1602_vm7 = vmand %vm130_vm5, %vm100_vm0  ;;  %v132_v37 = vld [vmem:[#allocation2 + $0x8] sm:$0x1]  ;;  %p1487_p1 = scmp.ne.s32.totalorder %s1091_s28, %s1486_s29  ;;  %p1492_p3 = scmp.lt.s32.totalorder %s1486_s29, %s1486_s29 }
  0x30   :  { %1262 = vmatprep.subr.bf16.mxu1 %v1373_v5  ;;  %v126_v33 = vld [vmem:[#allocation2] sm:$0xf]  ;;  %vm1608_vm8 = vmand %vm130_vm5, %vm124_vm2  ;;  %v1382_v43 = vld [vmem:[#allocation9 + $0xb8] sm:$0xff]  }
  0x31   :  { %v92_v20 = vmax.f32 %v90_v17, 0.0  ;;  %v93_v21 = vmax.f32 %v91_v18, 0.0  ;;  %v1384_v44 = vld [vmem:[#allocation9 + $0x40] sm:$0xff]   ;;  %v1385_v53 = vld [vmem:[#allocation9 + $0xb0] sm:$0xff]   ;;  %v1388_v0 = vld [vmem:[#allocation9 + $0xa8] sm:$0xff]   ;;  %p1493_p4 = por %p1492_p3, %p1491_p2 }
  0x32   :  { %1243 = vmatpush3.bf16.msra.mxu0 %v1368_v3  ;;  %v1390_v11 = vld [vmem:[#allocation9 + $0x98] sm:$0xff]   ;;  %v1392_v13 = vld [vmem:[#allocation9 + $0x88] sm:$0xff]   ;;  %v1393_v14 = vld [vmem:[#allocation9 + $0x80] sm:$0xff]  }
  0x33   :  { %1244 = vmatprep.subr.bf16.mxu0 %v1370_v6  ;;  %1263 = vmatpush3.bf16.msra.mxu1 %v1373_v5  ;;  %v1173_v23 = vpack.c.bf16 %v92_v20, %v92_v20  ;;  %v1174_v24 = vpack.c.bf16 %v93_v21, %v93_v21  ;;  %v1396_v15 = vld [vmem:[#allocation11 + $0x38] sm:$0xff]   ;;  %v1399_v18 = vld [vmem:[#allocation11 + $0x28] sm:$0xff]   ;;  %v1401_v20 = vld [vmem:[#allocation11 + $0x20] sm:$0xff]   ;;  %p1494_p5 = pnand %p1493_p4, %p1487_p1 }
  0x34   :  { %1264 = vmatprep.subr.bf16.mxu1 %v1375_v7  ;;  %v1398_v17 = vld [vmem:[#allocation11 + $0x78] sm:$0xff]   ;;  %v1402_v21 = vld [vmem:[#allocation11 + $0x68] sm:$0xff]  }
  0x35   :  { %v104_v28 = vshrl.u32 %v1173_v23, 16  ;;  %v107_v29 = vshll.u32 %v1173_v23, 16  ;;  %v112_v30 = vshrl.u32 %v1174_v24, 16  ;;  %v115_v31 = vshll.u32 %v1174_v24, 16  ;;  %v1404_v23 = vld [vmem:[#allocation11 + $0x60] sm:$0xff]   ;;  %v1405_v24 = vld [vmem:[#allocation11 + $0x10] sm:$0xff]  }
  0x36   :  { %1245 = vmatpush3.bf16.msra.mxu0 %v1370_v6  ;;  %v1420_v42 = vld [vmem:[#allocation11 + $0xa8] sm:$0xff]  }
  0x37   :  { %1246 = vmatprep.subr.bf16.mxu0 %v1372_v8  ;;  %1265 = vmatpush3.bf16.msra.mxu1 %v1375_v7  ;;  %v106_v34 = vrot.slane %v104_v28, 7  ;;  %v114_v35 = vrot.slane %v112_v30, 7  ;;  %v1389_v7 = vld [vmem:[#allocation9 + $0xa0] sm:$0xff]   ;;  %v1408_v28 = vld [vmem:[#allocation11 + $0x50] sm:$0xff]   ;;  %v1411_v30 = vld [vmem:[#allocation11 + $0x48] sm:$0xff]  }
  0x38   :  { %1266 = vmatprep.subr.bf16.mxu1 %v1377_v12 }
  0x39   :  { %v109_v38 = vor.u32 %v107_v29, %v106_v34  ;;  %v110_v39 = vrot.slane %v106_v34, 4  ;;  %v117_v40 = vor.u32 %v115_v31, %v114_v35  ;;  %v119_v41 = vrot.slane %v114_v35, 4  ;;  %v1409_v29 = vld [vmem:[#allocation11] sm:$0xff]   ;;  %v1624_v31 = vld [vmem:[#allocation11 + $0xb8] sm:$0xff]  }
  0x3a   :  { %1247 = vmatpush3.bf16.msra.mxu0 %v1372_v8 }
  0x3b   :  { %1248 = vmatprep.subr.bf16.mxu0 %v1374_v16  ;;  %1267 = vmatpush3.bf16.msra.mxu1 %v1377_v12  ;;  %v118_v45 = vsel %vm1591_vm4, %v110_v39, %v117_v40  ;;  %v127_v46 = vsel %vm1596_vm6, %v109_v38, %v126_v33  ;;  %v133_v47 = vsel %vm1602_vm7, %v119_v41, %v132_v37  ;;  %v1391_v12 = vld [vmem:[#allocation9 + $0x90] sm:$0xff]   ;;  %v1414_v33 = vld [vmem:[#allocation11 + $0x40] sm:$0xff]  }
  0x3c   :  { %1268 = vmatprep.subr.bf16.mxu1 %v1379_v19  ;;  %128 = vst [vmem:[#allocation2] sm:$0xf] %v127_v46  ;;  %129 = vst [vmem:[#allocation2 + $0x4] sm:$0xf] %v118_v45  ;;  %v1137_v45 = vld [vmem:[%s1664_s5] ss:$0 sm:$0xff] }
  0x3d   :  { %134 = vst [vmem:[#allocation2 + $0x8] sm:$0x1] %v133_v47 }
  0x3e   :  { %1249 = vmatpush3.bf16.msra.mxu0 %v1374_v16  ;;  %v1397_v16 = vld [vmem:[#allocation11 + $0x30] sm:$0xff]  }
  0x3f   :  { %1250 = vmatprep.subr.bf16.mxu0 %v1376_v22  ;;  %1269 = vmatpush3.bf16.msra.mxu1 %v1379_v19  ;;  %v1400_v19 = vld [vmem:[#allocation11 + $0x70] sm:$0xff]  }
  0x40   :  { %1270 = vmatprep.subr.bf16.mxu1 %v1381_v27 }
  0x42   :  { %1251 = vmatpush3.bf16.msra.mxu0 %v1376_v22  ;;  %v1403_v22 = vld [vmem:[#allocation11 + $0x18] sm:$0xff]  }
  0x43   :  { %1252 = vmatprep.subr.bf16.mxu0 %v1378_v26  ;;  %1271 = vmatpush3.bf16.msra.mxu1 %v1381_v27  ;;  %v135_v48 = vld [vmem:[#allocation2] sm:$0x1]  ;;  %v1394_v52 = vld [vmem:[#allocation2] sm:$0xfe]   ;;  %v1407_v27 = vld [vmem:[#allocation11 + $0x8] sm:$0xff]  }
  0x44   :  { %1272 = vmatprep.subr.bf16.mxu1 %v1384_v44  ;;  %v139_v49 = vld [vmem:[#allocation2 + $0x8] sm:$0x1]  ;;  %v136_v50 = vsel %vm1602_vm7, 0, %v135_v48  ;;  %v459_v58 = vrot.slane %v1394_v52, 1 }
  0x45   :  { %v140_v51 = vsel %vm1608_vm8, 0, %v139_v49  ;;  %137 = vst [vmem:[#allocation2] sm:$0x1] %v136_v50  ;;  %v1138_v49 = vld [vmem:[%s1665_s6] ss:$0 sm:$0xff] }
  0x46   :  { %1253 = vmatpush3.bf16.msra.mxu0 %v1378_v26  ;;  %141 = vst [vmem:[#allocation2 + $0x8] sm:$0x1] %v140_v51  ;;  %v1406_v26 = vld [vmem:[#allocation11 + $0x58] sm:$0xff]  }
  0x47   :  { %1278 = vmatprep.subr.bf16.mxu0 %v1382_v43  ;;  %1273 = vmatpush3.bf16.msra.mxu1 %v1384_v44 }
  0x48   :  { %1298 = vmatprep.subr.bf16.mxu1 %v1396_v15 }
  0x4c   :  { %v1380_v54 = vld [vmem:[#allocation2] sm:$0xff]  }
  0x4d   :  { %v1383_v55 = vld [vmem:[#allocation2 + $0x8] ss:$0 sps:$4 sm:$0xff]   ;;  %1254 = vmatprep.mubr.bf16.mxu0 %v1380_v54  ;;  %v1386_v56 = vld [vmem:[#allocation2] sm:$0xff]  }
  0x4e   :  { %v1387_v57 = vld [vmem:[#allocation2 + $0x8] sm:$0x1f]   ;;  %1255 = vmatmul.mubr.bf16.vlgmr.msra.gmra.mxu0 %v1383_v55  ;;  %v306_v60 = vshrl.u32 %v1386_v56, 16  ;;  %v308_v61 = vshll.u32 %v1386_v56, 16 }
  0x4f   :  { %v1395_v59 = vld [vmem:[#allocation2 + $0x8] sm:$0x1f]   ;;  %1279 = vmatpush3.bf16.msra.mxu0 %v1382_v43  ;;  %v313_v62 = vshll.u32 %v1387_v57, 16  ;;  %v317_v63 = vshrl.u32 %v1387_v57, 16 }
  0x50   :  { %1280 = vmatprep.subr.bf16.mxu0 %v1385_v53  ;;  %v460_v1 = vrot.slane %v1395_v59, 1  ;;  %v310_v2 = vrot.slane %v308_v61, 1 }
  0x51   :  { %v315_v3 = vrot.slane %v313_v62, 1 }
  0x52   :  { %v461_v4 = vsel %vm458_vm9, %v459_v58, %v460_v1  ;;  %v311_v5 = vor.u32 %v310_v2, %v306_v60 }
  0x53   :  { %1281 = vmatpush3.bf16.msra.mxu0 %v1385_v53  ;;  %v319_v6 = vor.u32 %v317_v63, %v315_v3  ;;  %1294 = vmatprep.mubr.bf16.mxu0 %v461_v4 }
  0x54   :  { %1282 = vmatprep.subr.bf16.mxu0 %v1388_v0  ;;  %v316_v8 = vsel %vm304_vm10, %v311_v5, %v315_v3 }
  0x55   :  { %1274 = vmatprep.mubr.bf16.mxu1 %v316_v8 }
  0x56   :  { %1275 = vmatmul.mubr.bf16.vlgmr.msra.gmra.mxu1 %v319_v6  ;;  %v637_v6 = vld [vmem:[#allocation3 + $0xc] sm:$0x1] }
  0x57   :  { %1283 = vmatpush3.bf16.msra.mxu0 %v1388_v0  ;;  %1299 = vmatpush3.bf16.msra.mxu1 %v1396_v15 }
  0x58   :  { %1284 = vmatprep.subr.bf16.mxu0 %v1389_v7  ;;  %1300 = vmatprep.subr.bf16.mxu1 %v1397_v16 }
  0x5b   :  { %1285 = vmatpush3.bf16.msra.mxu0 %v1389_v7  ;;  %1301 = vmatpush3.bf16.msra.mxu1 %v1397_v16 }
  0x5c   :  { %1286 = vmatprep.subr.bf16.mxu0 %v1390_v11  ;;  %1302 = vmatprep.subr.bf16.mxu1 %v1399_v18 }
  0x5f   :  { %1287 = vmatpush3.bf16.msra.mxu0 %v1390_v11  ;;  %1303 = vmatpush3.bf16.msra.mxu1 %v1399_v18 }
  0x60   :  { %1288 = vmatprep.subr.bf16.mxu0 %v1391_v12  ;;  %1304 = vmatprep.subr.bf16.mxu1 %v1401_v20 }
  0x63   :  { %1289 = vmatpush3.bf16.msra.mxu0 %v1391_v12  ;;  %1305 = vmatpush3.bf16.msra.mxu1 %v1401_v20 }
  0x64   :  { %1290 = vmatprep.subr.bf16.mxu0 %v1392_v13  ;;  %1306 = vmatprep.subr.bf16.mxu1 %v1403_v22 }
  0x67   :  { %1291 = vmatpush3.bf16.msra.mxu0 %v1392_v13  ;;  %1307 = vmatpush3.bf16.msra.mxu1 %v1403_v22  ;;  %v632_v13 = vld [vmem:[#allocation3] sm:$0xf] }
  0x68   :  { %1292 = vmatprep.subr.bf16.mxu0 %v1393_v14  ;;  %1308 = vmatprep.subr.bf16.mxu1 %v1405_v24 }
  0x6b   :  { %1293 = vmatpush3.bf16.msra.mxu0 %v1393_v14  ;;  %1309 = vmatpush3.bf16.msra.mxu1 %v1405_v24 }
  0x6c   :  { %1318 = vmatprep.subr.bf16.mxu0 %v1398_v17  ;;  %1310 = vmatprep.subr.bf16.mxu1 %v1407_v27 }
  0x6e   :  { %1295 = vmatmul.mubr.bf16.vlgmr.msra.gmra.mxu0 %v460_v1 }
  0x6f   :  { %1319 = vmatpush3.bf16.msra.mxu0 %v1398_v17  ;;  %1311 = vmatpush3.bf16.msra.mxu1 %v1407_v27 }
  0x70   :  { %1320 = vmatprep.subr.bf16.mxu0 %v1400_v19  ;;  %1312 = vmatprep.subr.bf16.mxu1 %v1409_v29 }
  0x73   :  { %1321 = vmatpush3.bf16.msra.mxu0 %v1400_v19  ;;  %1313 = vmatpush3.bf16.msra.mxu1 %v1409_v29 }
  0x74   :  { %1322 = vmatprep.subr.bf16.mxu0 %v1402_v21  ;;  %1338 = vmatprep.subr.bf16.mxu1 %v1624_v31 }
  0x77   :  { %1323 = vmatpush3.bf16.msra.mxu0 %v1402_v21 }
  0x78   :  { %1324 = vmatprep.subr.bf16.mxu0 %v1404_v23 }
  0x7b   :  { %1325 = vmatpush3.bf16.msra.mxu0 %v1404_v23 }
  0x7c   :  { %1326 = vmatprep.subr.bf16.mxu0 %v1406_v26 }
  0x7f   :  { %1327 = vmatpush3.bf16.msra.mxu0 %v1406_v26 }
  0x80   :  { %1328 = vmatprep.subr.bf16.mxu0 %v1408_v28 }
  0x83   :  { %1329 = vmatpush3.bf16.msra.mxu0 %v1408_v28 }
  0x84   :  { %1330 = vmatprep.subr.bf16.mxu0 %v1411_v30 }
  0x87   :  { %1331 = vmatpush3.bf16.msra.mxu0 %v1411_v30 }
  0x88   :  { %1332 = vmatprep.subr.bf16.mxu0 %v1414_v33 }
  0x8b   :  { %1333 = vmatpush3.bf16.msra.mxu0 %v1414_v33 }
 0x10e   :  { %v1256_v34 = vpop.f32.mrf.mxu0 }
 0x110   :  { %v253_v35 = vpop.f32.mrf.mxu0 }
 0x112   :  { %v1257_v37 = vpop.f32.mrf.mxu0 }
 0x114   :  { %v256_v41 = vpop.f32.mrf.mxu0 }
 0x116   :  { %v1276_v38 = vpop.f32.mrf.mxu1 }
 0x117   :  { %v420_v43 = vadd.f32 %v1276_v38, %v1256_v34 }
 0x118   :  { %v404_v39 = vpop.f32.mrf.mxu1 }
 0x119   :  { %v418_v46 = vadd.f32 %v404_v39, %v253_v35  ;;  %v1415_v35 = vld [vmem:[#allocation11 + $0xb0] sm:$0xff]  }
 0x11a   :  { %v1277_v40 = vpop.f32.mrf.mxu1 }
 0x11c   :  { %v407_v48 = vpop.f32.mrf.mxu1 }
 0x11d   :  { %v419_v54 = vadd.f32 %v407_v48, %v256_v41 }
 0x12e   :  { %v1296_v44 = vpop.f32.mrf.mxu0 }
 0x12f   :  { %v562_v47 = vadd.f32 %v1296_v44, %v420_v43 }
 0x130   :  { %v546_v50 = vpop.f32.mrf.mxu0 }
 0x131   :  { %v578_v51 = vmul.f32 %v1137_v45, %v562_v47  ;;  %v560_v52 = vadd.f32 %v546_v50, %v418_v46 }
 0x132   :  { %v1297_v53 = vpop.f32.mrf.mxu0 }
 0x133   :  { %v588_v55 = vadd.f32 %v1138_v49, %v578_v51  ;;  %v576_v56 = vmul.f32 %v1137_v45, %v560_v52  ;;  %v1421_v52 = vld [vmem:[#allocation11 + $0xa0] sm:$0xff]   ;;  %v1423_v53 = vld [vmem:[#allocation11 + $0x90] sm:$0xff]  }
 0x134   :  { %v549_v57 = vpop.f32.mrf.mxu0 }
 0x135   :  { %v591_v58 = vmax.f32 %v588_v55, 0.0  ;;  %v586_v59 = vadd.f32 %v1138_v49, %v576_v56  ;;  %v561_v60 = vadd.f32 %v549_v57, %v419_v54  ;;  %v1424_v54 = vld [vmem:[#allocation11 + $0x88] sm:$0xff]   ;;  %v1425_v55 = vld [vmem:[#allocation11 + $0x80] sm:$0xff]  }
 0x137   :  { %v1177_v61 = vpack.c.bf16 %v591_v58, %v591_v58  ;;  %v589_v62 = vmax.f32 %v586_v59, 0.0  ;;  %v577_v63 = vmul.f32 %v1137_v45, %v561_v60 }
 0x139   :  { %v620_v0 = vshrl.u32 %v1177_v61, 16  ;;  %v1175_v1 = vpack.c.bf16 %v589_v62, %v589_v62  ;;  %v587_v2 = vadd.f32 %v1138_v49, %v577_v63  ;;  %v623_v17 = vshll.u32 %v1177_v61, 16 }
 0x13b   :  { %v622_v3 = vrot.slane %v620_v0, 7  ;;  %v603_v4 = vshrl.u32 %v1175_v1, 16  ;;  %v590_v5 = vmax.f32 %v587_v2, 0.0  ;;  %v606_v11 = vshll.u32 %v1175_v1, 16 }
 0x13d   :  { %v627_v7 = vrot.slane %v622_v3, 4  ;;  %v605_v8 = vrot.slane %v603_v4, 7  ;;  %v1176_v12 = vpack.c.bf16 %v590_v5, %v590_v5  ;;  %v625_v21 = vor.u32 %v623_v17, %v622_v3  ;;  %v1172_v4 = vld [vmem:[%s1666_s7] ss:$0 sm:$0xff] }
 0x13f   :  { %v638_v14 = vsel %vm1602_vm7, %v627_v7, %v637_v6  ;;  %v608_v15 = vor.u32 %v606_v11, %v605_v8  ;;  %v611_v16 = vshrl.u32 %v1176_v12, 16  ;;  %v614_v20 = vshll.u32 %v1176_v12, 16 }
 0x140   :  { %639 = vst [vmem:[#allocation3 + $0xc] sm:$0x1] %v638_v14  ;;  %v609_v22 = vrot.slane %v605_v8, 4 }
 0x141   :  { %v633_v18 = vsel %vm1596_vm6, %v608_v15, %v632_v13  ;;  %v613_v19 = vrot.slane %v611_v16, 7 }
 0x142   :  { %634 = vst [vmem:[#allocation3] sm:$0xf] %v633_v18 }
 0x143   :  { %v616_v23 = vor.u32 %v614_v20, %v613_v19  ;;  %v618_v24 = vrot.slane %v613_v19, 4 }
 0x145   :  { %v617_v26 = vsel %vm1591_vm4, %v609_v22, %v616_v23  ;;  %v626_v27 = vsel %vm1591_vm4, %v618_v24, %v625_v21 }
 0x146   :  { %635 = vst [vmem:[#allocation3 + $0x4] sm:$0xf] %v617_v26  ;;  %636 = vst [vmem:[#allocation3 + $0x8] sm:$0xf] %v626_v27 }
 0x149   :  { %v640_v28 = vld [vmem:[#allocation3] sm:$0x1] }
 0x14a   :  { %v641_v32 = vsel %vm1602_vm7, 0, %v640_v28 }
 0x14b   :  { %642 = vst [vmem:[#allocation3] sm:$0x1] %v641_v32 }
 0x14d   :  { %v643_v29 = vld [vmem:[#allocation3 + $0x8] sm:$0x1]  ;;  %v1416_v37 = vld [vmem:[#allocation3] sm:$0xfe]  }
 0x14e   :  { %v644_v30 = vsel %vm1608_vm8, 0, %v643_v29  ;;  %v961_v36 = vrot.slane %v1416_v37, 1 }
 0x14f   :  { %645 = vst [vmem:[#allocation3 + $0x8] sm:$0x1] %v644_v30 }
 0x152   :  { %v1410_v33 = vld [vmem:[#allocation3] sm:$0xff]  }
 0x153   :  { %v1418_v34 = vld [vmem:[#allocation3] sm:$0xff]   ;;  %1314 = vmatprep.mubr.bf16.mxu1 %v1410_v33 }
 0x154   :  { %v811_v38 = vshll.u32 %v1418_v34, 16  ;;  %v809_v44 = vshrl.u32 %v1418_v34, 16 }
 0x156   :  { %v1413_v25 = vld [vmem:[#allocation3 + $0x8] ss:$0 sps:$4 sm:$0xff]   ;;  %v813_v41 = vrot.slane %v811_v38, 1 }
 0x157   :  { %v1417_v39 = vld [vmem:[#allocation3 + $0x8] sm:$0x1f]   ;;  %1315 = vmatmul.mubr.bf16.vlgmr.msra.gmra.mxu1 %v1413_v25 }
 0x158   :  { %v1419_v40 = vld [vmem:[#allocation3 + $0x8] sm:$0x1f]   ;;  %1339 = vmatpush3.bf16.msra.mxu1 %v1624_v31  ;;  %v962_v43 = vrot.slane %v1417_v39, 1  ;;  %v814_v47 = vor.u32 %v813_v41, %v809_v44  ;;  %v1422_v31 = vld [vmem:[#allocation11 + $0x98] sm:$0xff]  }
 0x159   :  { %v816_v45 = vshll.u32 %v1419_v40, 16  ;;  %1340 = vmatprep.subr.bf16.mxu1 %v1415_v35  ;;  %v820_v49 = vshrl.u32 %v1419_v40, 16 }
 0x15a   :  { %v963_v46 = vsel %vm458_vm9, %v961_v36, %v962_v43 }
 0x15b   :  { %v818_v48 = vrot.slane %v816_v45, 1  ;;  %1354 = vmatprep.mubr.bf16.mxu1 %v963_v46 }
 0x15c   :  { %1341 = vmatpush3.bf16.msra.mxu1 %v1415_v35 }
 0x15d   :  { %v819_v50 = vsel %vm304_vm10, %v814_v47, %v818_v48  ;;  %v822_v51 = vor.u32 %v820_v49, %v818_v48  ;;  %1342 = vmatprep.subr.bf16.mxu1 %v1420_v42 }
 0x15e   :  { %1334 = vmatprep.mubr.bf16.mxu0 %v819_v50 }
 0x15f   :  { %1335 = vmatmul.mubr.bf16.vlgmr.msra.gmra.mxu0 %v822_v51 }
 0x160   :  { %1343 = vmatpush3.bf16.msra.mxu1 %v1420_v42 }
 0x161   :  { %1344 = vmatprep.subr.bf16.mxu1 %v1421_v52 }
 0x164   :  { %1345 = vmatpush3.bf16.msra.mxu1 %v1421_v52 }
 0x165   :  { %1346 = vmatprep.subr.bf16.mxu1 %v1422_v31 }
 0x168   :  { %1347 = vmatpush3.bf16.msra.mxu1 %v1422_v31 }
 0x169   :  { %1348 = vmatprep.subr.bf16.mxu1 %v1423_v53 }
 0x16c   :  { %1349 = vmatpush3.bf16.msra.mxu1 %v1423_v53 }
 0x16d   :  { %1350 = vmatprep.subr.bf16.mxu1 %v1424_v54 }
 0x170   :  { %1351 = vmatpush3.bf16.msra.mxu1 %v1424_v54 }
 0x171   :  { %1352 = vmatprep.subr.bf16.mxu1 %v1425_v55 }
 0x174   :  { %1353 = vmatpush3.bf16.msra.mxu1 %v1425_v55 }
 0x177   :  { %1355 = vmatmul.mubr.bf16.vlgmr.msra.gmra.mxu1 %v962_v43 }
 0x217   :  { %v1316_v56 = vpop.f32.mrf.mxu1 }
 0x219   :  { %v757_v57 = vpop.f32.mrf.mxu1 }
 0x21b   :  { %v1317_v58 = vpop.f32.mrf.mxu1 }
 0x21d   :  { %v760_v62 = vpop.f32.mrf.mxu1 }
 0x21f   :  { %v1336_v59 = vpop.f32.mrf.mxu0 }
 0x221   :  { %v907_v60 = vpop.f32.mrf.mxu0 }
 0x222   :  { %v921_v0 = vadd.f32 %v907_v60, %v757_v57 }
 0x223   :  { %v1337_v61 = vpop.f32.mrf.mxu0 }
 0x225   :  { %v910_v1 = vpop.f32.mrf.mxu0 }
 0x226   :  { %v922_v6 = vadd.f32 %v910_v1, %v760_v62 }
 0x237   :  { %v1356_v63 = vpop.f32.mrf.mxu1 }
 0x239   :  { %v1048_v2 = vpop.f32.mrf.mxu1 }
 0x23a   :  { %v1062_v3 = vadd.f32 %v1048_v2, %v921_v0 }
 0x23b   :  { %v1357_v5 = vpop.f32.mrf.mxu1 }
 0x23c   :  { %v1072_v7 = vadd.f32 %v1062_v3, %v1577_v9 }
 0x23d   :  { %v1051_v8 = vpop.f32.mrf.mxu1 }
 0x23e   :  { %v1081_v11 = vadd.f32 %v1172_v4, %v1072_v7  ;;  %v1063_v12 = vadd.f32 %v1051_v8, %v922_v6 }
 0x240   :  { %1083 = vst [vmem:[#allocation12] sm:$0xff] %v1081_v11  ;;  %v1073_v13 = vadd.f32 %v1063_v12, %v1579_v10 }
 0x242   :  { %v1082_v14 = vadd.f32 %v1172_v4, %v1073_v13 }
 0x244   :  { %1084 = vst [vmem:[#allocation12 + $0x8] sm:$0xff] %v1082_v14 }
 0x245   :  { %1497 = shalt.err (!%p1494_p5)
}
 0x246   :  { %1096 = dma.vmem_to_hbm [thread:$0]  %s1091_s28, 256, %s1667_s8, [#allocation8], %s1516_s15, %s1516_s15, %s1517_s16  }
 0x247   :  { %1510 = dma.done.wait [#allocation8], 256  }
 0x248   :  { %1511 = vsyncadd [#allocation8], 4294967040 }
 0x249   :  { %1100 = vsyncpa [#allocation7], 1 }
 0x24a   :  { %1101 = vsyncpa [#allocation10], 1 }
 0x24b   :  { %1102 = vsyncpa [#allocation8], 1 }

</bundles_post_ra>
